<compile_context>
chip_gen: v7x
topology: tpu7x:2x2x1
jax: 0.10.0
libtpu: 0.0.40
codegen_flags: <defaults>
</compile_context>

<pallas_src>
import jax
import jax.numpy as jnp
from jax.experimental import pallas as pl
from jax.experimental.pallas import tpu as pltpu


def _ceil_to(x, m):
    return ((x + m - 1) // m) * m


def _choose_bblk(B):
    """Largest divisor of B that is <= 8 while (for B >= 2) keeping >= 2 grid
    steps so dimension_semantics=("parallel",) can split across v7x's 2 TCs."""
    target = max(1, min(8, B // 2)) if B >= 2 else 1
    for bb in range(target, 0, -1):
        if B % bb == 0:
            return bb
    return 1


# ----------------------------------------------------------------------------
# Fused kernel: (folded preprocess +) conv + ReLU + GAP + head.fc
# ----------------------------------------------------------------------------
def _make_fused_kernel(Bblk, S, KKC_pad, F, F_pad, C_pad, emit_feats):
    inv_s = 1.0 / float(S)
    M = Bblk * S

    def kernel(p_ref, w_ref, b_ref, fcw_ref, fcb_ref, *out_refs):
        # p_ref:   [1, Bblk*S, KKC_pad]  bf16 im2col patches (raw pixel space)
        # w_ref:   [KKC_pad, F_pad]      bf16 preprocess-folded conv weights
        # b_ref:   [1, F_pad]            f32  preprocess-folded conv bias
        # fcw_ref: [F_pad, C_pad]        f32  head.fc weight^T (zero-padded)
        # fcb_ref: [1, C_pad]            f32  head.fc bias (zero-padded)
        patches = p_ref[0]                                   # [M, KKC_pad] bf16
        # Single MXU pass: contraction dim 32 (vs. nine contraction-3 pushes).
        conv = jnp.dot(patches, w_ref[...],
                       preferred_element_type=jnp.float32)   # [M, F_pad] f32
        feat = jnp.maximum(conv + b_ref[...], 0.0)           # bias + ReLU (f32)

        # GAP per image: sublane reduction over S (XLU slot, overlaps MXU).
        if Bblk == 1:
            pooled = jnp.sum(feat, axis=0, keepdims=True) * inv_s       # [1, F_pad]
        else:
            pooled = jnp.sum(feat.reshape(Bblk, S, F_pad), axis=1) * inv_s

        logits = jnp.dot(pooled, fcw_ref[...],
                         preferred_element_type=jnp.float32) + fcb_ref[...]
        out_refs[0][...] = logits.reshape(1, Bblk, C_pad)     # lane-dense store
        if emit_feats:
            # Store only the real F feature columns (4x less HBM writeback).
            out_refs[1][...] = feat[:, :F].reshape(1, M, F)

    return kernel


def _fused_forward(patches, w_flat, b_eff, fc_wT, fc_b, Bblk, S, F, emit_feats):
    G, M, KKC_pad = patches.shape
    F_pad = w_flat.shape[1]
    C_pad = fc_b.shape[1]

    kernel = _make_fused_kernel(Bblk, S, KKC_pad, F, F_pad, C_pad, emit_feats)

    out_shape = [jax.ShapeDtypeStruct((G, Bblk, C_pad), jnp.float32)]
    out_specs = [pl.BlockSpec((1, Bblk, C_pad), lambda g: (g, 0, 0))]
    if emit_feats:
        out_shape.append(jax.ShapeDtypeStruct((G, M, F), jnp.float32))
        out_specs.append(pl.BlockSpec((1, M, F), lambda g: (g, 0, 0)))

    return pl.pallas_call(
        kernel,
        out_shape=out_shape,
        grid=(G,),
        in_specs=[
            pl.BlockSpec((1, M, KKC_pad), lambda g: (g, 0, 0)),
            pl.BlockSpec((KKC_pad, F_pad), lambda g: (0, 0)),
            pl.BlockSpec((1, F_pad), lambda g: (0, 0)),
            pl.BlockSpec((F_pad, C_pad), lambda g: (0, 0)),
            pl.BlockSpec((1, C_pad), lambda g: (0, 0)),
        ],
        out_specs=out_specs,
        compiler_params=pltpu.CompilerParams(
            dimension_semantics=("parallel",)),
    )(patches, w_flat, b_eff, fc_wT, fc_b)


# ----------------------------------------------------------------------------
# Standalone GAP + head.fc kernel (for the wrapper's head(feats) API)
# ----------------------------------------------------------------------------
def _make_gap_head_kernel(S, C_pad):
    inv_s = 1.0 / float(S)

    def kernel(feat_ref, w_ref, b_ref, o_ref):
        feat = feat_ref[0]                                     # [S, F]
        ones = jnp.full((1, S), inv_s, dtype=jnp.float32)
        pooled = jnp.dot(ones, feat, preferred_element_type=jnp.float32)
        logits = jnp.dot(pooled, w_ref[...],
                         preferred_element_type=jnp.float32) + b_ref[...]
        o_ref[...] = logits.reshape(1, 1, C_pad)

    return kernel


def gap_head(feats, fc_wT_cpad, fc_b_pad, num_classes):
    # TODO(synk): this path reads feats with last dim F=32 (lane-sparse); pad
    # to 128 here if model.head(feats) ever becomes a hot path.
    B, S, F = feats.shape
    C_pad = fc_b_pad.shape[1]
    out = pl.pallas_call(
        _make_gap_head_kernel(S, C_pad),
        out_shape=jax.ShapeDtypeStruct((B, 1, C_pad), jnp.float32),
        grid=(B,),
        in_specs=[
            pl.BlockSpec((1, S, F), lambda b: (b, 0, 0)),
            pl.BlockSpec((F, C_pad), lambda b: (0, 0)),
            pl.BlockSpec((1, C_pad), lambda b: (0, 0)),
        ],
        out_specs=pl.BlockSpec((1, 1, C_pad), lambda b: (b, 0, 0)),
        compiler_params=pltpu.CompilerParams(
            dimension_semantics=("parallel",)),
    )(feats, fc_wT_cpad, fc_b_pad)
    return out[:, 0, :num_classes]


# ----------------------------------------------------------------------------
# The wrapper (synthetic mmpretrain classifier with deterministic params)
# ----------------------------------------------------------------------------
class MMPretrainModelWrapperPallas:
    def __init__(self, hidden=32, num_classes=10, ksize=3, seed=0):
        self.hidden = hidden
        self._num_classes = num_classes
        self.ksize = ksize
        cin = 3
        self.cin = cin

        key = jax.random.PRNGKey(seed)
        k_conv, k_fc_w, k_fc_b = jax.random.split(key, 3)

        # backbone conv weight [K, K, Cin, F] (HWIO), bias [F]
        self.conv_w = (jax.random.normal(k_conv, (ksize, ksize, cin, hidden),
                                         dtype=jnp.float32) * 0.05)
        self.conv_b = jnp.zeros((hidden,), dtype=jnp.float32)

        # head.fc in PyTorch layout: weight [out_features, in_features], bias [out]
        self.fc_w = (jax.random.normal(k_fc_w, (num_classes, hidden),
                                       dtype=jnp.float32) * 0.05)
        self.fc_b = (jax.random.normal(k_fc_b, (num_classes,),
                                       dtype=jnp.float32) * 0.01)

        # mmpretrain ImageNet data_preprocessor mean/std (applied to x*255)
        self.mean = jnp.array([123.675, 116.28, 103.53], dtype=jnp.float32)
        self.std = jnp.array([58.395, 57.12, 57.375], dtype=jnp.float32)
        # TODO(synk): mmpretrain's data_preprocessor may also do a BGR->RGB
        # swap depending on config; only mean/std normalization is modeled.

        # ---- fold (x*255 - mean)/std into the conv (exact algebra) --------
        F = hidden
        C = num_classes
        F_pad = _ceil_to(F, 128)          # lane-dense feature dim
        C_pad = _ceil_to(C, 128)          # lane-dense class dim
        KKC = ksize * ksize * cin         # contraction dim of the im2col conv
        KKC_pad = _ceil_to(KKC, 32)       # 27 -> 32
        self.F_pad, self.C_pad = F_pad, C_pad
        self.KKC, self.KKC_pad = KKC, KKC_pad

        scale = 255.0 / self.std                                    # [cin]
        w_eff = self.conv_w * scale[None, None, :, None]            # [K,K,cin,F]
        b_eff = self.conv_b - jnp.einsum('hwcf,c->f', self.conv_w,
                                         self.mean / self.std)      # [F]

        # flatten taps+channels -> contraction dim; pad; cast to bf16 for MXU
        w_flat = w_eff.reshape(KKC, F)
        self.w_flat = (jnp.zeros((KKC_pad, F_pad), jnp.float32)
                       .at[:KKC, :F].set(w_flat)).astype(jnp.bfloat16)
        self.b_eff = jnp.zeros((1, F_pad), jnp.float32).at[0, :F].set(b_eff)

        fc_wT = self.fc_w.T                                         # [F, C]
        self.fc_wT_cpad = (jnp.zeros((F, C_pad), jnp.float32)
                           .at[:, :C].set(fc_wT))                   # head() path
        self.fc_wT_full = (jnp.zeros((F_pad, C_pad), jnp.float32)
                           .at[:F, :C].set(fc_wT))                  # fused path
        self.fc_b_pad = (jnp.zeros((1, C_pad), jnp.float32)
                         .at[0, :C].set(self.fc_b))

        # Border pad value in *raw* pixel space: normalizes to exactly 0, so
        # the folded conv matches "normalize then zero-pad" semantics.
        self.pad_val = self.mean / 255.0

    # --- mirrors of the PyTorch wrapper API ---
    def head_features(self):
        return self.hidden

    def num_classes(self):
        return self._num_classes

    def head_matrices(self):
        return (self.fc_w, self.fc_b)

    def head(self, feats):
        feats = jnp.asarray(feats, jnp.float32)
        return gap_head(feats, self.fc_wT_cpad, self.fc_b_pad,
                        self._num_classes)

    def __call__(self, x, return_features=False):
        """
        x: [B, 3, H, W] float image in [0, 1] (NCHW, PyTorch convention)
        returns: [B, C] logits (and [B, S, F] features if return_features)
        """
        B, Cin, H, W = x.shape
        K = self.ksize
        p = K // 2
        S = H * W

        # NCHW -> NHWC (channels last)
        x_nhwc = jnp.transpose(x, (0, 2, 3, 1)).astype(jnp.float32)

        # Pad border with mean/255 so the preprocess-folded conv sees values
        # that normalize to 0 (matches the reference zero-pad-after-normalize).
        pv = self.pad_val.reshape(1, 1, 1, Cin)
        xp = jnp.broadcast_to(pv, (B, H + 2 * p, W + 2 * p, Cin))
        xp = jax.lax.dynamic_update_slice(xp, x_nhwc, (0, p, p, 0))

        # Host-side im2col (input is a few KB, so this is negligible): lets the
        # kernel do ONE contraction-32 MXU matmul instead of nine contraction-3
        # pushes + nine unaligned sublane-shift relayouts + a spilling acc chain.
        cols = [xp[:, dh:dh + H, dw:dw + W, :]
                for dh in range(K) for dw in range(K)]
        patches = jnp.concatenate(cols, axis=-1).reshape(B, S, self.KKC)
        patches = jnp.pad(patches,
                          ((0, 0), (0, 0), (0, self.KKC_pad - self.KKC)))
        patches = patches.astype(jnp.bfloat16)    # bf16 MXU operand; halves DMA

        # Batch several images per grid step; keep >= 2 steps for v7x megacore.
        Bblk = _choose_bblk(B)
        G = B // Bblk
        patches = patches.reshape(G, Bblk * S, self.KKC_pad)

        outs = _fused_forward(patches, self.w_flat, self.b_eff, self.fc_wT_full,
                              self.fc_b_pad, Bblk, S, self.hidden,
                              return_features)
        logits = outs[0].reshape(B, self.C_pad)[:, :self._num_classes]
        if return_features:
            feats = outs[1].reshape(B, S, self.hidden)
            return logits, feats
        return logits


# ----------------------------------------------------------------------------
# Pure-JAX reference of the original (unfused, f32) forward, for verification
# ----------------------------------------------------------------------------
def _reference_forward(model, x):
    B, Cin, H, W = x.shape
    K = model.ksize
    p = K // 2
    x_nhwc = jnp.transpose(x, (0, 2, 3, 1)).astype(jnp.float32)
    xn = ((x_nhwc * 255.0 - model.mean.reshape(1, 1, 1, Cin))
          / model.std.reshape(1, 1, 1, Cin))
    xpad = jnp.pad(xn, ((0, 0), (p, p), (p, p), (0, 0)))
    acc = jnp.zeros((B, H, W, model.hidden), jnp.float32)
    for dh in range(K):
        for dw in range(K):
            acc = acc + jnp.einsum('bhwc,cf->bhwf',
                                   xpad[:, dh:dh + H, dw:dw + W, :],
                                   model.conv_w[dh, dw],
                                   preferred_element_type=jnp.float32)
    feat = jnp.maximum(acc + model.conv_b.reshape(1, 1, 1, -1), 0.0)
    feats = feat.reshape(B, H * W, model.hidden)
    pooled = jnp.mean(feats, axis=1)
    logits = pooled @ model.fc_w.T + model.fc_b
    return logits, feats


if __name__ == "__main__":
    key = jax.random.PRNGKey(0)
    B, C_in, H, W = 2, 3, 16, 16
    x = jax.random.uniform(key, (B, C_in, H, W), dtype=jnp.float32)

    model = MMPretrainModelWrapperPallas(hidden=32, num_classes=10, seed=0)

    logits, feats = model(x, return_features=True)
    logits = jax.block_until_ready(logits)
    feats = jax.block_until_ready(feats)

    assert logits.shape == (B, model.num_classes())
    assert feats.shape == (B, H * W, model.head_features())
    assert bool(jnp.all(jnp.isfinite(logits)))

    # bf16 MXU operands in the conv -> slightly looser tolerance than f32.
    ref_logits, ref_feats = _reference_forward(model, x)
    assert bool(jnp.allclose(logits, ref_logits, rtol=3e-2, atol=1e-2))
    assert bool(jnp.allclose(feats, ref_feats, rtol=3e-2, atol=1e-2))

    logits_only = jax.block_until_ready(model(x))
    assert bool(jnp.allclose(logits_only, ref_logits, rtol=3e-2, atol=1e-2))

    head_logits = jax.block_until_ready(model.head(feats))
    assert bool(jnp.allclose(head_logits, ref_logits, rtol=3e-2, atol=1e-2))

    print("KERNEL_OK")
</pallas_src>

<mosaic_0001>
module attributes {stable_mosaic.version = 11 : i64} {
  func.func @kernel(%arg0: i32, %arg1: memref<1x256x32xbf16, #tpu.memory_space<vmem>>, %arg2: memref<32x128xbf16, #tpu.memory_space<vmem>>, %arg3: memref<1x128xf32, #tpu.memory_space<vmem>>, %arg4: memref<128x128xf32, #tpu.memory_space<vmem>>, %arg5: memref<1x128xf32, #tpu.memory_space<vmem>>, %arg6: memref<1x1x128xf32, #tpu.memory_space<vmem>>, %arg7: memref<1x256x32xf32, #tpu.memory_space<vmem>>) attributes {dimension_semantics = [#tpu.dimension_semantics<parallel>], iteration_bounds = array<i64: 2>, scalar_prefetch = 0 : i64, scratch_operands = 0 : i64, tpu.core_type = #tpu.core_type<tc>, window_params = [{transform_indices = @transform_0, window_bounds = array<i64: 1, 256, 32>}, {pipeline_mode = #tpu.pipeline_mode<synchronous>, transform_indices = @transform_1, window_bounds = array<i64: 32, 128>}, {pipeline_mode = #tpu.pipeline_mode<synchronous>, transform_indices = @transform_2, window_bounds = array<i64: 1, 128>}, {pipeline_mode = #tpu.pipeline_mode<synchronous>, transform_indices = @transform_3, window_bounds = array<i64: 128, 128>}, {pipeline_mode = #tpu.pipeline_mode<synchronous>, transform_indices = @transform_4, window_bounds = array<i64: 1, 128>}, {transform_indices = @transform_5, window_bounds = array<i64: 1, 1, 128>}, {transform_indices = @transform_6, window_bounds = array<i64: 1, 256, 32>}]} {
    %c0 = arith.constant 0 : index
    %c0_0 = arith.constant 0 : index
    %c0_1 = arith.constant 0 : index
    %0 = vector.load %arg1[%c0, %c0_0, %c0_1] : memref<1x256x32xbf16, #tpu.memory_space<vmem>>, vector<1x256x32xbf16>
    %1 = vector.shape_cast %0 : vector<1x256x32xbf16> to vector<256x32xbf16>
    %c0_2 = arith.constant 0 : index
    %c0_3 = arith.constant 0 : index
    %2 = vector.load %arg2[%c0_2, %c0_3] : memref<32x128xbf16, #tpu.memory_space<vmem>>, vector<32x128xbf16>
    %cst = arith.constant dense<0.000000e+00> : vector<256x128xf32>
    %3 = tpu.matmul %1, %2, %cst {dimension_numbers = #tpu.dot_dimension_numbers<[1], [0], [0], [1], [0, 0, 1, 1], [], []>} : vector<256x32xbf16>, vector<32x128xbf16>, vector<256x128xf32> -> vector<256x128xf32>
    %c0_4 = arith.constant 0 : index
    %c0_5 = arith.constant 0 : index
    %4 = vector.load %arg3[%c0_4, %c0_5] : memref<1x128xf32, #tpu.memory_space<vmem>>, vector<1x128xf32>
    %5 = vector.broadcast %4 : vector<1x128xf32> to vector<256x128xf32>
    %6 = arith.addf %3, %5 : vector<256x128xf32>
    %cst_6 = arith.constant 0.000000e+00 : f32
    %7 = vector.broadcast %cst_6 : f32 to vector<256x128xf32>
    %8 = arith.maximumf %6, %7 : vector<256x128xf32>
    %cst_7 = arith.constant dense<0.000000e+00> : vector<128xf32>
    %9 = vector.multi_reduction <add>, %8, %cst_7 [0] : vector<256x128xf32> to vector<128xf32>
    %10 = vector.shape_cast %9 : vector<128xf32> to vector<1x128xf32>
    %cst_8 = arith.constant 3.906250e-03 : f32
    %11 = vector.broadcast %cst_8 : f32 to vector<1x128xf32>
    %12 = arith.mulf %10, %11 : vector<1x128xf32>
    %c0_9 = arith.constant 0 : index
    %c0_10 = arith.constant 0 : index
    %13 = vector.load %arg4[%c0_9, %c0_10] : memref<128x128xf32, #tpu.memory_space<vmem>>, vector<128x128xf32>
    %cst_11 = arith.constant dense<0.000000e+00> : vector<1x128xf32>
    %14 = tpu.matmul %12, %13, %cst_11 {dimension_numbers = #tpu.dot_dimension_numbers<[1], [0], [0], [1], [0, 0, 1, 1], [], []>} : vector<1x128xf32>, vector<128x128xf32>, vector<1x128xf32> -> vector<1x128xf32>
    %c0_12 = arith.constant 0 : index
    %c0_13 = arith.constant 0 : index
    %15 = vector.load %arg5[%c0_12, %c0_13] : memref<1x128xf32, #tpu.memory_space<vmem>>, vector<1x128xf32>
    %16 = arith.addf %14, %15 : vector<1x128xf32>
    %17 = vector.shape_cast %16 : vector<1x128xf32> to vector<1x1x128xf32>
    %c0_14 = arith.constant 0 : index
    %c0_15 = arith.constant 0 : index
    %c0_16 = arith.constant 0 : index
    %18 = vector.load %arg6[%c0_14, %c0_15, %c0_16] : memref<1x1x128xf32, #tpu.memory_space<vmem>>, vector<1x1x128xf32>
    tpu.vector_store %arg6[%c0_14, %c0_15, %c0_16], %17 {strides = array<i32>} : memref<1x1x128xf32, #tpu.memory_space<vmem>>, vector<1x1x128xf32>,
    %19 = vector.extract_strided_slice %8 {offsets = [0, 0], sizes = [256, 32], strides = [1, 1]} : vector<256x128xf32> to vector<256x32xf32>
    %20 = vector.shape_cast %19 : vector<256x32xf32> to vector<1x256x32xf32>
    %c0_17 = arith.constant 0 : index
    %c0_18 = arith.constant 0 : index
    %c0_19 = arith.constant 0 : index
    %21 = vector.load %arg7[%c0_17, %c0_18, %c0_19] : memref<1x256x32xf32, #tpu.memory_space<vmem>>, vector<1x256x32xf32>
    tpu.vector_store %arg7[%c0_17, %c0_18, %c0_19], %20 {strides = array<i32>} : memref<1x256x32xf32, #tpu.memory_space<vmem>>, vector<1x256x32xf32>,
    return
  }
  func.func @transform_0(%arg0: i32) -> (i32, i32, i32) {
    %c0_i32 = arith.constant 0 : i32
    %c0_i32_0 = arith.constant 0 : i32
    %c0_i32_1 = arith.constant 0 : i32
    return %arg0, %c0_i32, %c0_i32_0 : i32, i32, i32
  }
  func.func @transform_1(%arg0: i32) -> (i32, i32) {
    %c0_i32 = arith.constant 0 : i32
    %c0_i32_0 = arith.constant 0 : i32
    %c0_i32_1 = arith.constant 0 : i32
    return %c0_i32, %c0_i32_0 : i32, i32
  }
  func.func @transform_2(%arg0: i32) -> (i32, i32) {
    %c0_i32 = arith.constant 0 : i32
    %c0_i32_0 = arith.constant 0 : i32
    %c0_i32_1 = arith.constant 0 : i32
    return %c0_i32, %c0_i32_0 : i32, i32
  }
  func.func @transform_3(%arg0: i32) -> (i32, i32) {
    %c0_i32 = arith.constant 0 : i32
    %c0_i32_0 = arith.constant 0 : i32
    %c0_i32_1 = arith.constant 0 : i32
    return %c0_i32, %c0_i32_0 : i32, i32
  }
  func.func @transform_4(%arg0: i32) -> (i32, i32) {
    %c0_i32 = arith.constant 0 : i32
    %c0_i32_0 = arith.constant 0 : i32
    %c0_i32_1 = arith.constant 0 : i32
    return %c0_i32, %c0_i32_0 : i32, i32
  }
  func.func @transform_5(%arg0: i32) -> (i32, i32, i32) {
    %c0_i32 = arith.constant 0 : i32
    %c0_i32_0 = arith.constant 0 : i32
    %c0_i32_1 = arith.constant 0 : i32
    return %arg0, %c0_i32, %c0_i32_0 : i32, i32, i32
  }
  func.func @transform_6(%arg0: i32) -> (i32, i32, i32) {
    %c0_i32 = arith.constant 0 : i32
    %c0_i32_0 = arith.constant 0 : i32
    %c0_i32_1 = arith.constant 0 : i32
    return %arg0, %c0_i32, %c0_i32_0 : i32, i32, i32
  }
}

</mosaic_0001>

<bundles_post_ra>
// kernel: tpu_custom_call.1
= control target key start
LH: loop header
LB: loop body
LE: loop exit
PB: predicated region body
PF: predicated region fallthrough
CT: control target
= control target key end

     0   :  { %12 = vsyncpa [#allocation3], 0  ;;  %s1604_s0 = inlined_call_operand.vmem [shape: bf16[2,256,32], index: 0, kind: input, shape index: {}]   ;;  %s1605_s1 = inlined_call_operand.vmem [shape: bf16[32,128], index: 1, kind: input, shape index: {}]   ;;  %s1606_s2 = inlined_call_operand.vmem [shape: f32[1,128], index: 2, kind: input, shape index: {}]   ;;  %s1607_s3 = inlined_call_operand.vmem [shape: f32[128,128], index: 3, kind: input, shape index: {}]   ;;  %s1608_s4 = inlined_call_operand.vmem [shape: f32[1,128], index: 4, kind: input, shape index: {}]   ;;  %s1609_s5 = inlined_call_operand.hbm [shape: f32[2,1,128], index: 5, kind: output, shape index: {0}]   ;;  %s1610_s6 = inlined_call_operand.vmem [shape: f32[2,256,32], index: 6, kind: output, shape index: {1}]  }
   0x1   :  { %14 = vsyncpa [#allocation3 + $0x1], 0  ;;  %s1244_s21 = smov 0   ;;  %s1246_s22 = smov 0  }
   0x2   :  { %s1248_s23 = smov 0   ;;  %s1250_s24 = smov 0  }
   0x3 LB: > { %s1265_s25 = sadd.s32 4294967295, %s1203_s24   ;;  %s899_s26 = sadd.s32 4294967294, %s1203_s24   ;;  %s1203_s24 = sphi %s1250_s24, %s1616_s24   ;;  %s1199_s23 = sphi %s1248_s23, %s1615_s23   ;;  %s1195_s22 = sphi %s1246_s22, %s1614_s22   ;;  %s1191_s21 = sphi %s1244_s21, %s1613_s21  }
   0x4   : > { %s1269_s27 = sadd.s32 1, %s1203_s24   ;;  %s137_s28 = sadd.s32 1, %s1199_s23 }
   0x5   : > { %s134_s29 = ssub.s32 %s1203_s24, %s1269_s27  ;;  %p147_p0 = scmp.ne.s32.totalorder %s1199_s23, %s1195_s22 }
   0x6   : > { %p135_p1 = scmp.eq.s32.totalorder %s134_s29, 0  ;;  %p148_p2 = scmp.eq.s32.totalorder %s1265_s25, 1 }
   0x7   : > { %p153_p3 = scmp.ne.s32.totalorder %s1195_s22, %s1191_s21  ;;  %p154_p4 = scmp.eq.s32.totalorder %s899_s26, 1 }
   0x8   : > { %s1280_s30 = scalar_select %p135_p1, %s1199_s23, %s137_s28  }
   0x9   : > { %p1282_p5 = por %p148_p2, %p147_p0  ;;  %p1286_p6 = por %p154_p4, %p153_p3 }
   0xa   : > { %p902_p7 = scmp.ge.s32.totalorder %s1203_s24, 1  ;;  %p218_p8 = scmp.lt.s32.totalorder %s1203_s24, 3 }
   0xc   : > { %p219_p9 = pnand %p902_p7, %p218_p8 }
   0xd   : > { %v1123_v0 = vld [vmem:[%s1605_s1] sm:$0xff] (!%p219_p9)   ;;  %p252_p10 = scmp.lt.s32.totalorder (!%p219_p9), %s1265_s25, 1  ;;  %v1124_v1 = vld [vmem:[%s1605_s1 + $0x8] sm:$0xff] (!%p219_p9)   ;;  %vm398_vm0 = vcmask (!%p219_p9), 261120   ;;  %v1205_v21 = vmov (!%p219_p9), 0.0|0.0   ;;  %v680_v22 = vld [vmem:[%s1607_s3 + $0x10] sm:$0xff] (!%p219_p9) }
   0xe   : > { %222 = sbr.rel (%p219_p9) target bundleno = 550 (0x226), region = 40  ;;  %982 = vmatprep.subr.bf16.mxu0 (!%p219_p9), %v1123_v0  ;;  %1077 = vmatprep.subr.bf16.mxu1 (!%p219_p9), %v1123_v0  ;;  %v678_v18 = vld [vmem:[%s1607_s3] sm:$0xff] (!%p219_p9)  ;;  %v679_v19 = vld [vmem:[%s1607_s3 + $0x8] sm:$0xff] (!%p219_p9)  ;;  %v681_v23 = vld [vmem:[%s1607_s3 + $0x18] sm:$0xff] (!%p219_p9)  ;;  %vm1206_vm1 = vmmov (!%p219_p9), 0   ;;  %v1207_v43 = vmov (!%p219_p9), 0.0  }
   0xf   : > { %983 = vmatpush3.bf16.msra.mxu0 (!%p219_p9), %v1123_v0  ;;  %1079 = vmatpush3.bf16.msra.mxu1 (!%p219_p9), %v1123_v0  ;;  %v1054_v20 = vpack.c.bf16 (!%p219_p9), %v679_v19, %v678_v18  ;;  %v1057_v24 = vpack.c.bf16 (!%p219_p9), %v681_v23, %v680_v22  ;;  %v682_v25 = vld [vmem:[%s1607_s3 + $0x20] sm:$0xff] (!%p219_p9)  ;;  %v683_v26 = vld [vmem:[%s1607_s3 + $0x28] sm:$0xff] (!%p219_p9)  ;;  %v684_v28 = vld [vmem:[%s1607_s3 + $0x30] sm:$0xff] (!%p219_p9)  ;;  %s942_s16 = sshll.u32 (!%p219_p9), %s1265_s25, 4 }
  0x10   : > { %984 = vmatprep.subr.bf16.mxu0 (!%p219_p9), %v1124_v1  ;;  %1078 = vmatprep.subr.bf16.mxu1 (!%p219_p9), %v1124_v1  ;;  %v1060_v27 = vpack.c.bf16 (!%p219_p9), %v683_v26, %v682_v25  ;;  %v685_v29 = vld [vmem:[%s1607_s3 + $0x38] sm:$0xff] (!%p219_p9)  ;;  %v686_v31 = vld [vmem:[%s1607_s3 + $0x40] sm:$0xff] (!%p219_p9)  ;;  %v687_v32 = vld [vmem:[%s1607_s3 + $0x48] sm:$0xff] (!%p219_p9)  ;;  %s1562_s26 = scalar_lea.hbm (!%p219_p9), %s1609_s5, %s942_s16 }
  0x11   : > { %v1063_v30 = vpack.c.bf16 (!%p219_p9), %v685_v29, %v684_v28  ;;  %v1066_v33 = vpack.c.bf16 (!%p219_p9), %v687_v32, %v686_v31  ;;  %v688_v34 = vld [vmem:[%s1607_s3 + $0x50] sm:$0xff] (!%p219_p9)  ;;  %v689_v35 = vld [vmem:[%s1607_s3 + $0x58] sm:$0xff] (!%p219_p9)  ;;  %v690_v37 = vld [vmem:[%s1607_s3 + $0x60] sm:$0xff] (!%p219_p9) }
  0x12   : > { %v1069_v36 = vpack.c.bf16 (!%p219_p9), %v689_v35, %v688_v34  ;;  %v691_v38 = vld [vmem:[%s1607_s3 + $0x68] sm:$0xff] (!%p219_p9)  ;;  %v692_v40 = vld [vmem:[%s1607_s3 + $0x70] sm:$0xff] (!%p219_p9)  ;;  %v693_v41 = vld [vmem:[%s1607_s3 + $0x78] sm:$0xff] (!%p219_p9) }
  0x13   : > { %985 = vmatpush3.bf16.msra.mxu0 (!%p219_p9), %v1124_v1  ;;  %1080 = vmatpush3.bf16.msra.mxu1 (!%p219_p9), %v1124_v1  ;;  %v1072_v39 = vpack.c.bf16 (!%p219_p9), %v691_v38, %v690_v37  ;;  %v1075_v42 = vpack.c.bf16 (!%p219_p9), %v693_v41, %v692_v40  ;;  %v1391_v44 = vld [vmem:[%s1606_s2] ss:$0 sm:$0xff] (!%p219_p9) }
  0x14   : > { %1053 = vmatprep.subr.bf16.mxu1 (!%p219_p9), %v1205_v21 }
  0x15   : > { %s1300_s13 = scalar_select %p252_p10, %s1265_s25, 1 }
  0x16   : > { %s1208_s25 = smov [#allocation2]  }
  0x17   : > { %s945_s14 = sshll.u32 %s1300_s13, 7  ;;  %s946_s9 = sshll.u32 %s1300_s13, 8 }
  0x18   : > { %s1306_s17 = scalar_lea.vmem %s1604_s0, %s945_s14  ;;  %s1398_s12 = scalar_lea.vmem %s1610_s6, %s946_s9 }
  0x19   : > { %v1125_v2 = vld [vmem:[%s1306_s17] sm:$0xff]   ;;  %v1126_v3 = vld [vmem:[%s1306_s17 + $0x8] sm:$0xff]   ;;  %v1127_v4 = vld [vmem:[%s1306_s17 + $0x10] sm:$0xff]   ;;  %s243_s13 = sand.u32 1, %s1195_s22   ;;  %s1145_s9 = sshll.u32 %s1208_s25, 4  ;;  %s1146_s9 = int_to_ptr.vmem [resolvable:$false] %s1145_s9 }
  0x1a   : > { %986 = vmatprep.mubr.msk.bf16.mxu0 %vm398_vm0, %v1125_v2  ;;  %v1128_v5 = vld [vmem:[%s1306_s17 + $0x18] sm:$0xff]   ;;  %v1129_v6 = vld [vmem:[%s1306_s17 + $0x20] sm:$0xff]   ;;  %v1134_v8 = vld [vmem:[%s1306_s17 + $0x48] sm:$0xff]   ;;  %s799_s28 = scalar_lea.sflag [#allocation3], %s243_s13  ;;  %s1147_s10 = scalar_lea.vmem %s1146_s9, 32 }
  0x1b   : > { %987 = vmatmul.mubr.msk.bf16.vlgmr.msra.gmra.mrb[0].mxu0 %vm398_vm0, %v1126_v3  ;;  %v1133_v7 = vld [vmem:[%s1306_s17 + $0x40] sm:$0xff]   ;;  %v1135_v9 = vld [vmem:[%s1306_s17 + $0x50] sm:$0xff]   ;;  %v1136_v10 = vld [vmem:[%s1306_s17 + $0x58] sm:$0xff]  }
  0x1c   : > { %990 = vmatprep.mubr.msk.bf16.mxu0 %vm398_vm0, %v1127_v4  ;;  %1002 = vmatprep.mubr.msk.bf16.mxu1 %vm398_vm0, %v1133_v7  ;;  %v1130_v11 = vld [vmem:[%s1306_s17 + $0x28] sm:$0xff]   ;;  %v1137_v12 = vld [vmem:[%s1306_s17 + $0x60] sm:$0xff]   ;;  %v1131_v13 = vld [vmem:[%s1306_s17 + $0x30] sm:$0xff]  }
  0x1d   : > { %1003 = vmatmul.mubr.msk.bf16.vlgmr.msra.gmra.mrb[0].mxu1 %vm398_vm0, %v1134_v8  ;;  %v1138_v14 = vld [vmem:[%s1306_s17 + $0x68] sm:$0xff]   ;;  %v1132_v15 = vld [vmem:[%s1306_s17 + $0x38] sm:$0xff]   ;;  %v1139_v16 = vld [vmem:[%s1306_s17 + $0x70] sm:$0xff]  }
  0x1e   : > { %1006 = vmatprep.mubr.msk.bf16.mxu1 %vm398_vm0, %v1135_v9  ;;  %v1140_v17 = vld [vmem:[%s1306_s17 + $0x78] sm:$0xff]   ;;  %1055 = vmatpush3.bf16.msra.mxu1 %v1054_v20  ;;  %s244_s17 = scalar_lea.vmem [#allocation2], %s243_s13 }
  0x1f   : > { %1056 = vmatprep.subr.bf16.mxu1 %v1205_v21  ;;  %s816_s18 = sshll.u32 %s244_s17, 4  ;;  %s1564_s18 = int_to_ptr.vmem [resolvable:$true] %s816_s18 }
  0x20   : > { %s1141_s29 = scalar_lea.vmem %s1564_s18, 16  ;;  %p1148_p0 = scmp.lt.s32.totalorder %s1564_s18, %s1146_s9 }
  0x21   : > { %p1142_p11 = scmp.ne.s32.totalorder %s1564_s18, %s1141_s29  ;;  %p1149_p1 = scmp.lt.s32.totalorder %s1147_s10, %s1141_s29 }
  0x22   : > { %1058 = vmatpush3.bf16.msra.mxu1 %v1057_v24 }
  0x23   : > { %991 = vmatmul.mubr.msk.bf16.gmra.mrb[4].mxu0 %vm398_vm0, %v1128_v5  ;;  %1059 = vmatprep.subr.bf16.mxu1 %v1205_v21  ;;  %p1143_p12 = pnand %p1142_p11, %p1282_p5  ;;  %p1150_p2 = por %p1149_p1, %p1148_p0 }
  0x24   : > { %994 = vmatprep.mubr.msk.bf16.mxu0 %vm398_vm0, %v1129_v6 }
  0x25   : > { %1007 = vmatmul.mubr.msk.bf16.gmra.mrb[4].mxu1 %vm398_vm0, %v1136_v10  ;;  %p1144_p13 = pneg %p1143_p12 }
  0x26   : > { %1010 = vmatprep.mubr.msk.bf16.mxu1 %vm398_vm0, %v1137_v12  ;;  %1061 = vmatpush3.bf16.msra.mxu1 %v1060_v27 }
  0x27   : > { %1062 = vmatprep.subr.bf16.mxu1 %v1205_v21  ;;  %p1151_p3 = pnand %p1150_p2, %p1144_p13 }
  0x2a   : > { %1064 = vmatpush3.bf16.msra.mxu1 %v1063_v30 }
  0x2b   : > { %995 = vmatmul.mubr.msk.bf16.gmra.mrb[8].mxu0 %vm398_vm0, %v1130_v11  ;;  %1065 = vmatprep.subr.bf16.mxu1 %v1205_v21 }
  0x2c   : > { %998 = vmatprep.mubr.msk.bf16.mxu0 %vm398_vm0, %v1131_v13 }
  0x2d   : > { %1011 = vmatmul.mubr.msk.bf16.gmra.mrb[8].mxu1 %vm398_vm0, %v1138_v14 }
  0x2e   : > { %1014 = vmatprep.mubr.msk.bf16.mxu1 %vm398_vm0, %v1139_v16  ;;  %1067 = vmatpush3.bf16.msra.mxu1 %v1066_v33 }
  0x2f   : > { %1068 = vmatprep.subr.bf16.mxu1 %v1205_v21 }
  0x32   : > { %1070 = vmatpush3.bf16.msra.mxu1 %v1069_v36 }
  0x33   : > { %999 = vmatmul.mubr.msk.bf16.gmra.mrb[12].mxu0 %vm398_vm0, %v1132_v15  ;;  %1071 = vmatprep.subr.bf16.mxu1 %v1205_v21 }
  0x35   : > { %1015 = vmatmul.mubr.msk.bf16.gmra.mrb[12].mxu1 %vm398_vm0, %v1140_v17 }
  0x36   : > { %1073 = vmatpush3.bf16.msra.mxu1 %v1072_v39  ;;  %1050 = vmatprep.mubr.msk.f32.mxu1 %vm1206_vm1, %v1207_v43 }
  0x37   : > { %1074 = vmatprep.subr.bf16.mxu1 %v1205_v21 }
  0x3a   : > { %1076 = vmatpush3.bf16.msra.mxu1 %v1075_v42 }
  0xee   : > { %v988_v45 = vpop.f32.mrb[0].mxu0 }
  0xef   : > { %v490_v46 = vadd.f32 %v988_v45, %v1391_v44  ;;  %v481_v47 = vpop.f32.mrb[1].mxu0 }
  0xf0   : > { %v482_v48 = vadd.f32 %v1391_v44, %v481_v47  ;;  %v989_v49 = vpop.f32.mrb[2].mxu0  ;;  %v1004_v57 = vpop.f32.mrb[0].mxu1 }
  0xf1   : > { %v610_v50 = vmax.f32 %v490_v46, 0.0  ;;  %v493_v51 = vadd.f32 %v989_v49, %v1391_v44  ;;  %v484_v52 = vpop.f32.mrb[3].mxu0  ;;  %v1412_v60 = vadd.f32 %v1004_v57, %v1391_v44  ;;  %v545_v61 = vpop.f32.mrb[1].mxu1 }
  0xf2   : > { %v608_v53 = vmax.f32 %v482_v48, 0.0  ;;  %v485_v54 = vadd.f32 %v1391_v44, %v484_v52  ;;  %v1416_v0 = vadd.f32 %v1391_v44, %v545_v61  ;;  %v1005_v1 = vpop.f32.mrb[2].mxu1 }
  0xf3   : > { %768 = vst.msk [vmem:[%s1398_s12 + $0x10] sm:$0xff] %vm398_vm0, %v610_v50  ;;  %v611_v55 = vmax.f32 %v493_v51, 0.0  ;;  %v626_v5 = vmax.f32 %v1412_v60, 0.0  ;;  %v1421_v6 = vadd.f32 %v1005_v1, %v1391_v44  ;;  %v548_v7 = vpop.f32.mrb[3].mxu1 }
  0xf4   : > { %766 = vst.msk [vmem:[%s1398_s12] sm:$0xff] %vm398_vm0, %v608_v53  ;;  %v609_v56 = vmax.f32 %v485_v54, 0.0  ;;  %v624_v11 = vmax.f32 %v1416_v0, 0.0  ;;  %v1426_v12 = vadd.f32 %v1391_v44, %v548_v7 }
  0xf5   : > { %769 = vst.msk [vmem:[%s1398_s12 + $0x18] sm:$0xff] %vm398_vm0, %v611_v55  ;;  %784 = vst.msk [vmem:[%s1398_s12 + $0x90] sm:$0xff] %vm398_vm0, %v626_v5  ;;  %v627_v16 = vmax.f32 %v1421_v6, 0.0 }
  0xf6   : > { %v640_v58 = vadd.f32 %v609_v56, %v608_v53  ;;  %767 = vst.msk [vmem:[%s1398_s12 + $0x8] sm:$0xff] %vm398_vm0, %v609_v56  ;;  %v992_v59 = vpop.f32.mrb[4].mxu0  ;;  %782 = vst.msk [vmem:[%s1398_s12 + $0x80] sm:$0xff] %vm398_vm0, %v624_v11  ;;  %v625_v18 = vmax.f32 %v1426_v12, 0.0 }
  0xf7   : > { %v506_v62 = vadd.f32 %v992_v59, %v1391_v44  ;;  %v497_v63 = vpop.f32.mrb[5].mxu0  ;;  %785 = vst.msk [vmem:[%s1398_s12 + $0x98] sm:$0xff] %vm398_vm0, %v627_v16 }
  0xf8   : > { %v641_v2 = vadd.f32 %v640_v58, %v610_v50  ;;  %v498_v3 = vadd.f32 %v1391_v44, %v497_v63  ;;  %v993_v4 = vpop.f32.mrb[6].mxu0  ;;  %783 = vst.msk [vmem:[%s1398_s12 + $0x88] sm:$0xff] %vm398_vm0, %v625_v18  ;;  %v1008_v21 = vpop.f32.mrb[4].mxu1 }
  0xf9   : > { %v614_v8 = vmax.f32 %v506_v62, 0.0  ;;  %v509_v9 = vadd.f32 %v993_v4, %v1391_v44  ;;  %v500_v10 = vpop.f32.mrb[7].mxu0  ;;  %v1456_v24 = vadd.f32 %v1008_v21, %v1391_v44  ;;  %v561_v25 = vpop.f32.mrb[5].mxu1 }
  0xfa   : > { %v612_v13 = vmax.f32 %v498_v3, 0.0  ;;  %v642_v14 = vadd.f32 %v641_v2, %v611_v55  ;;  %v501_v15 = vadd.f32 %v1391_v44, %v500_v10  ;;  %v1460_v28 = vadd.f32 %v1391_v44, %v561_v25  ;;  %v1009_v29 = vpop.f32.mrb[6].mxu1 }
  0xfb   : > { %772 = vst.msk [vmem:[%s1398_s12 + $0x30] sm:$0xff] %vm398_vm0, %v614_v8  ;;  %v615_v17 = vmax.f32 %v509_v9, 0.0  ;;  %v630_v33 = vmax.f32 %v1456_v24, 0.0  ;;  %v1465_v34 = vadd.f32 %v1009_v29, %v1391_v44  ;;  %v564_v35 = vpop.f32.mrb[7].mxu1 }
  0xfc   : > { %v643_v19 = vadd.f32 %v642_v14, %v612_v13  ;;  %770 = vst.msk [vmem:[%s1398_s12 + $0x20] sm:$0xff] %vm398_vm0, %v612_v13  ;;  %v613_v20 = vmax.f32 %v501_v15, 0.0  ;;  %v628_v39 = vmax.f32 %v1460_v28, 0.0  ;;  %v1470_v40 = vadd.f32 %v1391_v44, %v564_v35 }
  0xfd   : > { %773 = vst.msk [vmem:[%s1398_s12 + $0x38] sm:$0xff] %vm398_vm0, %v615_v17  ;;  %788 = vst.msk [vmem:[%s1398_s12 + $0xb0] sm:$0xff] %vm398_vm0, %v630_v33  ;;  %v631_v45 = vmax.f32 %v1465_v34, 0.0  ;;  %v694_v34 = vld [vmem:[%s1608_s4] sm:$0x1] }
  0xfe   : > { %v644_v22 = vadd.f32 %v643_v19, %v613_v20  ;;  %771 = vst.msk [vmem:[%s1398_s12 + $0x28] sm:$0xff] %vm398_vm0, %v613_v20  ;;  %v996_v23 = vpop.f32.mrb[8].mxu0  ;;  %786 = vst.msk [vmem:[%s1398_s12 + $0xa0] sm:$0xff] %vm398_vm0, %v628_v39  ;;  %v629_v47 = vmax.f32 %v1470_v40, 0.0 }
  0xff   : > { %v522_v26 = vadd.f32 %v996_v23, %v1391_v44  ;;  %v513_v27 = vpop.f32.mrb[9].mxu0  ;;  %789 = vst.msk [vmem:[%s1398_s12 + $0xb8] sm:$0xff] %vm398_vm0, %v631_v45 }
 0x100   : > { %v645_v30 = vadd.f32 %v644_v22, %v614_v8  ;;  %v514_v31 = vadd.f32 %v1391_v44, %v513_v27  ;;  %v997_v32 = vpop.f32.mrb[10].mxu0  ;;  %787 = vst.msk [vmem:[%s1398_s12 + $0xa8] sm:$0xff] %vm398_vm0, %v629_v47  ;;  %v1012_v50 = vpop.f32.mrb[8].mxu1 }
 0x101   : > { %v618_v36 = vmax.f32 %v522_v26, 0.0  ;;  %v525_v37 = vadd.f32 %v997_v32, %v1391_v44  ;;  %v516_v38 = vpop.f32.mrb[11].mxu0  ;;  %v1500_v53 = vadd.f32 %v1012_v50, %v1391_v44  ;;  %v577_v54 = vpop.f32.mrb[9].mxu1 }
 0x102   : > { %v616_v41 = vmax.f32 %v514_v31, 0.0  ;;  %v646_v42 = vadd.f32 %v645_v30, %v615_v17  ;;  %v517_v43 = vadd.f32 %v1391_v44, %v516_v38  ;;  %v578_v57 = vadd.f32 %v1391_v44, %v577_v54  ;;  %v1013_v58 = vpop.f32.mrb[10].mxu1 }
 0x103   : > { %776 = vst.msk [vmem:[%s1398_s12 + $0x50] sm:$0xff] %vm398_vm0, %v618_v36  ;;  %v619_v46 = vmax.f32 %v525_v37, 0.0  ;;  %v634_v63 = vmax.f32 %v1500_v53, 0.0  ;;  %v589_v1 = vadd.f32 %v1013_v58, %v1391_v44  ;;  %v580_v2 = vpop.f32.mrb[11].mxu1 }
 0x104   : > { %v647_v48 = vadd.f32 %v646_v42, %v616_v41  ;;  %774 = vst.msk [vmem:[%s1398_s12 + $0x40] sm:$0xff] %vm398_vm0, %v616_v41  ;;  %v617_v49 = vmax.f32 %v517_v43, 0.0  ;;  %v632_v8 = vmax.f32 %v578_v57, 0.0  ;;  %v581_v9 = vadd.f32 %v1391_v44, %v580_v2 }
 0x105   : > { %777 = vst.msk [vmem:[%s1398_s12 + $0x58] sm:$0xff] %vm398_vm0, %v619_v46  ;;  %792 = vst.msk [vmem:[%s1398_s12 + $0xd0] sm:$0xff] %vm398_vm0, %v634_v63  ;;  %v635_v15 = vmax.f32 %v589_v1, 0.0 }
 0x106   : > { %v648_v51 = vadd.f32 %v647_v48, %v617_v49  ;;  %775 = vst.msk [vmem:[%s1398_s12 + $0x48] sm:$0xff] %vm398_vm0, %v617_v49  ;;  %v1000_v52 = vpop.f32.mrb[12].mxu0  ;;  %790 = vst.msk [vmem:[%s1398_s12 + $0xc0] sm:$0xff] %vm398_vm0, %v632_v8  ;;  %v633_v19 = vmax.f32 %v581_v9, 0.0 }
 0x107   : > { %v538_v55 = vadd.f32 %v1000_v52, %v1391_v44  ;;  %v529_v56 = vpop.f32.mrb[13].mxu0  ;;  %793 = vst.msk [vmem:[%s1398_s12 + $0xd8] sm:$0xff] %vm398_vm0, %v635_v15 }
 0x108   : > { %v649_v59 = vadd.f32 %v648_v51, %v618_v36  ;;  %v530_v61 = vadd.f32 %v1391_v44, %v529_v56  ;;  %v1001_v62 = vpop.f32.mrb[14].mxu0  ;;  %791 = vst.msk [vmem:[%s1398_s12 + $0xc8] sm:$0xff] %vm398_vm0, %v633_v19  ;;  %v1016_v22 = vpop.f32.mrb[12].mxu1 }
 0x109   : > { %v622_v3 = vmax.f32 %v538_v55, 0.0  ;;  %v541_v4 = vadd.f32 %v1001_v62, %v1391_v44  ;;  %v532_v7 = vpop.f32.mrb[15].mxu0  ;;  %v602_v25 = vadd.f32 %v1016_v22, %v1391_v44  ;;  %v593_v26 = vpop.f32.mrb[13].mxu1 }
 0x10a   : > { %v620_v10 = vmax.f32 %v530_v61, 0.0  ;;  %v650_v13 = vadd.f32 %v649_v59, %v619_v46  ;;  %v533_v14 = vadd.f32 %v1391_v44, %v532_v7  ;;  %v594_v27 = vadd.f32 %v1391_v44, %v593_v26  ;;  %v1017_v29 = vpop.f32.mrb[14].mxu1 }
 0x10b   : > { %780 = vst.msk [vmem:[%s1398_s12 + $0x70] sm:$0xff] %vm398_vm0, %v622_v3  ;;  %v623_v17 = vmax.f32 %v541_v4, 0.0  ;;  %v638_v31 = vmax.f32 %v602_v25, 0.0  ;;  %v605_v32 = vadd.f32 %v1017_v29, %v1391_v44  ;;  %v596_v35 = vpop.f32.mrb[15].mxu1 }
 0x10c   : > { %v651_v20 = vadd.f32 %v650_v13, %v620_v10  ;;  %778 = vst.msk [vmem:[%s1398_s12 + $0x60] sm:$0xff] %vm398_vm0, %v620_v10  ;;  %v621_v21 = vmax.f32 %v533_v14, 0.0  ;;  %v636_v36 = vmax.f32 %v594_v27, 0.0  ;;  %v597_v37 = vadd.f32 %v1391_v44, %v596_v35 }
 0x10d   : > { %781 = vst.msk [vmem:[%s1398_s12 + $0x78] sm:$0xff] %vm398_vm0, %v623_v17  ;;  %796 = vst.msk [vmem:[%s1398_s12 + $0xf0] sm:$0xff] %vm398_vm0, %v638_v31  ;;  %v639_v41 = vmax.f32 %v605_v32, 0.0 }
 0x10e   : > { %v652_v23 = vadd.f32 %v651_v20, %v621_v21  ;;  %779 = vst.msk [vmem:[%s1398_s12 + $0x68] sm:$0xff] %vm398_vm0, %v621_v21  ;;  %794 = vst.msk [vmem:[%s1398_s12 + $0xe0] sm:$0xff] %vm398_vm0, %v636_v36  ;;  %v637_v42 = vmax.f32 %v597_v37, 0.0 }
 0x10f   : > { %797 = vst.msk [vmem:[%s1398_s12 + $0xf8] sm:$0xff] %vm398_vm0, %v639_v41 }
 0x110   : > { %v653_v30 = vadd.f32 %v652_v23, %v622_v3  ;;  %795 = vst.msk [vmem:[%s1398_s12 + $0xe8] sm:$0xff] %vm398_vm0, %v637_v42 }
 0x112   : > { %v654_v38 = vadd.f32 %v653_v30, %v623_v17 }
 0x114   : > { %v655_v43 = vadd.f32 %v654_v38, %v624_v11 }
 0x116   : > { %v656_v46 = vadd.f32 %v655_v43, %v625_v18 }
 0x118   : > { %v657_v44 = vadd.f32 %v656_v46, %v626_v5 }
 0x11a   : > { %v658_v48 = vadd.f32 %v657_v44, %v627_v16 }
 0x11c   : > { %v659_v49 = vadd.f32 %v658_v48, %v628_v39 }
 0x11e   : > { %v660_v0 = vadd.f32 %v659_v49, %v629_v47 }
 0x120   : > { %v661_v11 = vadd.f32 %v660_v0, %v630_v33 }
 0x122   : > { %v662_v50 = vadd.f32 %v661_v11, %v631_v45 }
 0x124   : > { %v663_v12 = vadd.f32 %v662_v50, %v632_v8 }
 0x126   : > { %v664_v18 = vadd.f32 %v663_v12, %v633_v19 }
 0x128   : > { %v665_v60 = vadd.f32 %v664_v18, %v634_v63 }
 0x12a   : > { %v666_v5 = vadd.f32 %v665_v60, %v635_v15 }
 0x12c   : > { %v667_v6 = vadd.f32 %v666_v5, %v636_v36 }
 0x12e   : > { %v668_v16 = vadd.f32 %v667_v6, %v637_v42 }
 0x130   : > { %v669_v51 = vadd.f32 %v668_v16, %v638_v31 }
 0x132   : > { %v670_v28 = vadd.f32 %v669_v51, %v639_v41 }
 0x134   : > { %v671_v39 = vrot.slane %v670_v28, 4 }
 0x136   : > { %v672_v52 = vadd.f32 %v671_v39, %v670_v28 }
 0x138   : > { %v673_v40 = vrot.slane %v672_v52, 2 }
 0x13a   : > { %v674_v47 = vadd.f32 %v673_v40, %v672_v52 }
 0x13c   : > { %v675_v53 = vrot.slane %v674_v47, 1 }
 0x13e   : > { %v676_v24 = vadd.f32 %v675_v53, %v674_v47 }
 0x140   : > { %v677_v33 = vmul.f32 0.00390625, %v676_v24 }
 0x142   : > { %1051 = vmatmul.mubr.f32.vlgmr.msra.gmra.mrb[16].mxu1 %v677_v33 }
 0x215   : > { %v761_v45 = vpop.f32.mrb[16].mxu1 }
 0x216   : > { %v762_v54 = vadd.f32 %v761_v45, %v694_v34  ;;  %v1052_v55 = vpop.f32.mrb[17].mxu1 }
 0x218   : > { %765 = vst [vmem:[%s244_s17] sm:$0x1] %v762_v54 }
 0x219   : > { %1154 = shalt.err (!%p1151_p3)
}
 0x21a   : > { %s1155_s11 = scalar_lea.hbm %s1562_s26, 16  ;;  %s1159_s14 = scalar_lea.hbm %s1609_s5, 32 }
 0x21b   : > { %p1156_p4 = scmp.ne.s32.totalorder %s1562_s26, %s1155_s11  ;;  %p1160_p9 = scmp.lt.u32.totalorder %s1562_s26, %s1609_s5 }
 0x21c   : > { %p1161_p10 = scmp.lt.u32.totalorder %s1159_s14, %s1155_s11  ;;  %p1163_p12 = scmp.lt.u32.totalorder %s1155_s11, %s1562_s26 }
 0x21d   : > { %p1157_p7 = pnand %p1156_p4, %p1282_p5 }
 0x21e   : > { %p1162_p11 = por %p1161_p10, %p1160_p9 }
 0x21f   : > { %p1158_p8 = pneg %p1157_p7 }
 0x220   : > { %p1164_p13 = por %p1163_p12, %p1162_p11 }
 0x222   : > { %p1165_p0 = pnand %p1164_p13, %p1158_p8 }
 0x224   : > { %1168 = shalt.err (!%p1165_p0)
}
 0x225   : > { %1081 = dma.vmem_to_hbm [thread:$0]  (%p1282_p5), %s1564_s18, 16, %s1562_s26, %s799_s28  }
 0x226 PF: > { %p1087_p1 = scmp.ge.s32.totalorder %s1203_s24, 2  ;;  %s831_s17 = sand.u32 1, %s1191_s21  }
 0x227   : > { %s832_s19 = scalar_lea.sflag [#allocation3], %s831_s17 }
 0x228   : > { %p1084_p2 = pnand %p1087_p1, %p1286_p6 }
 0x22a   : > { %1186 = dma.done.wait (!%p1084_p2), %s832_s19, 16  }
 0x22b   : > { %1188 = vsyncadd (!%p1084_p2), %s832_s19, 4294967280  ;;  %p17_p3 = scmp.ge.s32.totalorder %s1269_s27, 4   ;;  %s1613_s21 = smov %s1195_s22 }
 0x22c   : > { %s1614_s22 = smov %s1199_s23  ;;  %s1615_s23 = smov %s1280_s30 }
 0x22d   : > { %s1616_s24 = smov %s1269_s27  ;;  %19 = sbr.rel (!%p17_p3) target bundleno = 3 (0x3), region = 87 }
 0x234   :  { %844 = vsyncpa [#allocation3], 1 }
 0x235   :  { %846 = vsyncpa [#allocation3 + $0x1], 1 }

</bundles_post_ra>
